<compile_context>
chip_gen: v6e
topology: v6e:2x2x1
jax: 0.10.0
libtpu: 0.0.40
codegen_flags: <defaults>
</compile_context>

<pallas_src>
import jax
import jax.numpy as jnp
from jax import lax
from jax.experimental import pallas as pl
from jax.experimental.pallas import tpu as pltpu

EPS = 1e-6
LANES = 128        # vreg lane width
TM_MAX = 2048      # rows per block: 2048*128*4B = 1 MiB f32 per input block
                   # -> 2 inputs x 2 pipeline buffers x 1 MiB = 4 MiB VMEM
NUM_CORES = 2      # split the reduction across 2 TensorCores (v7x);
                   # runs serially (and correctly) on 1-TC chips (v5e/v6e)


def _make_kernel(tm, rows, steps_per_core):
    def kernel(x_ref, y_ref, o_ref, acc_ref):
        c = pl.program_id(0)
        i = pl.program_id(1)

        @pl.when(i == 0)
        def _():
            acc_ref[...] = jnp.zeros_like(acc_ref)

        # Cast to f32 inside the kernel; inputs stay in their native dtype
        # in HBM/VMEM so HBM bytes moved are minimal for bf16/fp8 callers.
        diff = x_ref[...].astype(jnp.float32) - y_ref[...].astype(jnp.float32)
        err = jnp.sqrt(diff * diff + EPS)

        # Mask rows outside [0, rows): covers the ragged last block and the
        # (clamped) padding block of the two-core split.
        row_start = (c * steps_per_core + i) * tm
        row_ids = row_start + lax.broadcasted_iota(jnp.int32, (tm, LANES), 0)
        err = jnp.where(row_ids < rows, err, 0.0)

        # Vector accumulate: fold tm rows into the (8, LANES) accumulator.
        # Pure VPU adds in the hot loop; no per-step XLU reduce, no scalar
        # read-modify-write dependency chain.
        acc_ref[...] += err.reshape(tm // 8, 8, LANES).sum(axis=0)

        # Single lane-dense writeback per core; the one cross-lane reduction
        # happens in the wrapper on a tiny (NUM_CORES*8, 128) array.
        @pl.when(i == pl.num_programs(1) - 1)
        def _():
            o_ref[...] = acc_ref[...]

    return kernel


def l1_charbonnier_loss(x, y):
    """Pallas TPU implementation of L1 Charbonnier loss (sum reduction)."""
    assert x.shape == y.shape, "X and Y must have the same shape"
    xf = jnp.ravel(x)
    yf = jnp.ravel(y)
    n = xf.shape[0]

    # Sub-128 tail (at most 127 elements) handled with plain jnp.
    n_lane = (n // LANES) * LANES
    tail = jnp.float32(0.0)
    if n_lane < n:
        dt = xf[n_lane:].astype(jnp.float32) - yf[n_lane:].astype(jnp.float32)
        tail = jnp.sum(jnp.sqrt(dt * dt + jnp.float32(EPS)))
    if n_lane == 0:
        return tail

    rows = n_lane // LANES
    x2d = xf[:n_lane].reshape(rows, LANES)
    y2d = yf[:n_lane].reshape(rows, LANES)

    # Sublane granularity: 8 for 4-byte dtypes, 16 for bf16, 32 for 1-byte.
    itemsize = jnp.dtype(x.dtype).itemsize
    sub = max(8, 32 // max(1, itemsize))
    tm = min(TM_MAX, ((rows + sub - 1) // sub) * sub)
    n_blocks = pl.cdiv(rows, tm)
    spc = pl.cdiv(n_blocks, NUM_CORES)       # grid steps per core

    def in_map(c, i):
        # Clamp: the (at most one) padding step of the 2-core split re-reads
        # the last real block; its rows are masked off inside the kernel.
        return (jnp.minimum(c * spc + i, n_blocks - 1), 0)

    out = pl.pallas_call(
        _make_kernel(tm, rows, spc),
        out_shape=jax.ShapeDtypeStruct((NUM_CORES * 8, LANES), jnp.float32),
        grid_spec=pltpu.PrefetchScalarGridSpec(
            num_scalar_prefetch=0,
            grid=(NUM_CORES, spc),
            in_specs=[
                pl.BlockSpec((tm, LANES), in_map),
                pl.BlockSpec((tm, LANES), in_map),
            ],
            out_specs=pl.BlockSpec((8, LANES), lambda c, i: (c, 0)),
            scratch_shapes=[pltpu.VMEM((8, LANES), jnp.float32)],
        ),
        compiler_params=pltpu.CompilerParams(
            dimension_semantics=("parallel", "arbitrary"),
        ),
    )(x2d, y2d)

    # Per-core (8,128) partials -> scalar, plus the tiny unaligned tail.
    return jnp.sum(out) + tail


if __name__ == "__main__":
    key = jax.random.PRNGKey(0)
    kx, ky = jax.random.split(key)
    # NCHW inputs consistent with the PyTorch module: batch=2, channels=4, 16x16
    X = jax.random.normal(kx, (2, 4, 16, 16), dtype=jnp.float32)
    Y = jax.random.normal(ky, (2, 4, 16, 16), dtype=jnp.float32)

    loss = jax.jit(l1_charbonnier_loss)(X, Y)
    jax.block_until_ready(loss)

    # Reference check (pure JAX)
    ref = jnp.sum(jnp.sqrt((X - Y) ** 2 + EPS))
    assert jnp.allclose(loss, ref, rtol=1e-5, atol=1e-4), (loss, ref)
    print("KERNEL_OK")
</pallas_src>

<mosaic_0001>
module attributes {stable_mosaic.version = 11 : i64} {
  func.func @kernel(%arg0: i32, %arg1: i32, %arg2: memref<16x128xf32, #tpu.memory_space<vmem>>, %arg3: memref<16x128xf32, #tpu.memory_space<vmem>>, %arg4: memref<8x128xf32, #tpu.memory_space<vmem>>, %arg5: memref<8x128xf32, #tpu.memory_space<vmem>>) attributes {dimension_semantics = [#tpu.dimension_semantics<parallel>, #tpu.dimension_semantics<arbitrary>], iteration_bounds = array<i64: 2, 1>, scalar_prefetch = 0 : i64, scratch_operands = 1 : i64, tpu.core_type = #tpu.core_type<tc>, window_params = [{transform_indices = @transform_0, window_bounds = array<i64: 16, 128>}, {transform_indices = @transform_1, window_bounds = array<i64: 16, 128>}, {transform_indices = @transform_2, window_bounds = array<i64: 8, 128>}]} {
    %c0_i32 = arith.constant 0 : i32
    %0 = arith.cmpi eq, %arg1, %c0_i32 : i32
    %1 = arith.extui %0 : i1 to i32
    %c0_i32_0 = arith.constant 0 : i32
    %2 = arith.cmpi ne, %1, %c0_i32_0 : i32
    scf.if %2 {
      %cst_13 = arith.constant 0.000000e+00 : f32
      %28 = vector.broadcast %cst_13 : f32 to vector<8x128xf32>
      %c0_14 = arith.constant 0 : index
      %c0_15 = arith.constant 0 : index
      %29 = vector.load %arg5[%c0_14, %c0_15] : memref<8x128xf32, #tpu.memory_space<vmem>>, vector<8x128xf32>
      tpu.vector_store %arg5[%c0_14, %c0_15], %28 {strides = array<i32>} : memref<8x128xf32, #tpu.memory_space<vmem>>, vector<8x128xf32>,
    } else {
    }
    %c0 = arith.constant 0 : index
    %c0_1 = arith.constant 0 : index
    %3 = vector.load %arg2[%c0, %c0_1] : memref<16x128xf32, #tpu.memory_space<vmem>>, vector<16x128xf32>
    %c0_2 = arith.constant 0 : index
    %c0_3 = arith.constant 0 : index
    %4 = vector.load %arg3[%c0_2, %c0_3] : memref<16x128xf32, #tpu.memory_space<vmem>>, vector<16x128xf32>
    %5 = arith.subf %3, %4 : vector<16x128xf32>
    %6 = arith.mulf %5, %5 : vector<16x128xf32>
    %cst = arith.constant 9.99999997E-7 : f32
    %7 = vector.broadcast %cst : f32 to vector<16x128xf32>
    %8 = arith.addf %6, %7 : vector<16x128xf32>
    %9 = math.sqrt %8 : vector<16x128xf32>
    %c1_i32 = arith.constant 1 : i32
    %10 = arith.muli %arg0, %c1_i32 : i32
    %11 = arith.addi %10, %arg1 : i32
    %c16_i32 = arith.constant 16 : i32
    %12 = arith.muli %11, %c16_i32 : i32
    %13 = tpu.iota {dimensions = array<i32: 0>} : vector<16x128xi32>
    %14 = vector.broadcast %12 : i32 to vector<16x128xi32>
    %15 = arith.addi %14, %13 : vector<16x128xi32>
    %c16_i32_4 = arith.constant 16 : i32
    %16 = vector.broadcast %c16_i32_4 : i32 to vector<16x128xi32>
    %17 = arith.cmpi slt, %15, %16 : vector<16x128xi32>
    %cst_5 = arith.constant 0.000000e+00 : f32
    %18 = vector.broadcast %cst_5 : f32 to vector<16x128xf32>
    %19 = arith.select %17, %9, %18 : vector<16x128xi1>, vector<16x128xf32>
    %c0_6 = arith.constant 0 : index
    %c0_7 = arith.constant 0 : index
    %20 = vector.load %arg5[%c0_6, %c0_7] : memref<8x128xf32, #tpu.memory_space<vmem>>, vector<8x128xf32>
    %21 = vector.shape_cast %19 : vector<16x128xf32> to vector<2x8x128xf32>
    %cst_8 = arith.constant dense<0.000000e+00> : vector<8x128xf32>
    %22 = vector.multi_reduction <add>, %21, %cst_8 [0] : vector<2x8x128xf32> to vector<8x128xf32>
    %23 = arith.addf %20, %22 : vector<8x128xf32>
    %c0_9 = arith.constant 0 : index
    %c0_10 = arith.constant 0 : index
    %24 = vector.load %arg5[%c0_9, %c0_10] : memref<8x128xf32, #tpu.memory_space<vmem>>, vector<8x128xf32>
    tpu.vector_store %arg5[%c0_9, %c0_10], %23 {strides = array<i32>} : memref<8x128xf32, #tpu.memory_space<vmem>>, vector<8x128xf32>,
    %c0_i32_11 = arith.constant 0 : i32
    %25 = arith.cmpi eq, %arg1, %c0_i32_11 : i32
    %26 = arith.extui %25 : i1 to i32
    %c0_i32_12 = arith.constant 0 : i32
    %27 = arith.cmpi ne, %26, %c0_i32_12 : i32
    scf.if %27 {
      %c0_13 = arith.constant 0 : index
      %c0_14 = arith.constant 0 : index
      %28 = vector.load %arg5[%c0_13, %c0_14] : memref<8x128xf32, #tpu.memory_space<vmem>>, vector<8x128xf32>
      %c0_15 = arith.constant 0 : index
      %c0_16 = arith.constant 0 : index
      %29 = vector.load %arg4[%c0_15, %c0_16] : memref<8x128xf32, #tpu.memory_space<vmem>>, vector<8x128xf32>
      tpu.vector_store %arg4[%c0_15, %c0_16], %28 {strides = array<i32>} : memref<8x128xf32, #tpu.memory_space<vmem>>, vector<8x128xf32>,
    } else {
    }
    return
  }
  func.func @transform_0(%arg0: i32, %arg1: i32) -> (i32, i32) {
    %c1_i32 = arith.constant 1 : i32
    %0 = arith.muli %arg0, %c1_i32 : i32
    %1 = arith.addi %0, %arg1 : i32
    %c0_i32 = arith.constant 0 : i32
    %2 = arith.minsi %1, %c0_i32 : i32
    %c0_i32_0 = arith.constant 0 : i32
    %c0_i32_1 = arith.constant 0 : i32
    return %2, %c0_i32_0 : i32, i32
  }
  func.func @transform_1(%arg0: i32, %arg1: i32) -> (i32, i32) {
    %c1_i32 = arith.constant 1 : i32
    %0 = arith.muli %arg0, %c1_i32 : i32
    %1 = arith.addi %0, %arg1 : i32
    %c0_i32 = arith.constant 0 : i32
    %2 = arith.minsi %1, %c0_i32 : i32
    %c0_i32_0 = arith.constant 0 : i32
    %c0_i32_1 = arith.constant 0 : i32
    return %2, %c0_i32_0 : i32, i32
  }
  func.func @transform_2(%arg0: i32, %arg1: i32) -> (i32, i32) {
    %c0_i32 = arith.constant 0 : i32
    %c0_i32_0 = arith.constant 0 : i32
    return %arg0, %c0_i32 : i32, i32
  }
}

</mosaic_0001>

<bundles_post_ra>
// kernel: l1_charbonnier_loss.1
= control target key start
LH: loop header
LB: loop body
LE: loop exit
PB: predicated region body
PF: predicated region fallthrough
CT: control target
= control target key end

     0   :  { %s423_s9 = smov 0   ;;  %s425_s10 = smov 0   ;;  %s466_s0 = inlined_call_operand.vmem [shape: f32[16,128], index: 0, kind: input, shape index: {}]   ;;  %s467_s1 = inlined_call_operand.vmem [shape: f32[16,128], index: 1, kind: input, shape index: {}]   ;;  %s468_s2 = inlined_call_operand.vmem [shape: f32[16,128], index: 2, kind: output, shape index: {}]  }
   0x1   :  { %s427_s11 = smov 0  }
   0x2 LB: > { %s24_s12 = sadd.s32 1, %s402_s10  ;;  %p347_p0 = scmp.ge.s32.totalorder %s406_s11, 1  ;;  %s406_s11 = sphi %s427_s11, %s12_s11   ;;  %s402_s10 = sphi %s425_s10, %s470_s10   ;;  %s398_s9 = sphi %s423_s9, %s469_s9  }
   0x3   : > { %p26_p1 = scmp.ge.s32.totalorder %s24_s12, 2  ;;  %p160_p2 = scmp.lt.s32.totalorder %s406_s11, 3 }
   0x5   : > { %s472_s12 = smov (%p26_p1, %s24_s12), 0  ;;  %p161_p3 = pnand %p347_p0, %p160_p2 }
   0x6   : > { %p193_p4 = scmp.lt.s32.totalorder (!%p161_p3), %s398_s9, 0  ;;  %s353_s22 = sshll.u32 (!%p161_p3), %s398_s9, 4 }
   0x7   : > { %164 = sbr.rel (%p161_p3) target bundleno = 51 (0x33), region = 28  ;;  %p216_p6 = scmp.lt.s32.totalorder (!%p161_p3), %s398_s9, 1 }
   0xc   : > { %s194_s13 = scalar_select %p193_p4, %s398_s9, 0  ;;  %v251_v10 = vlaneseq  ;;  %v254_v13 = vstv %s353_s22 }
   0xd   : > { %s476_s9 = smov (!%p216_p6, %s398_s9), 1 }
   0xe   : > { %s348_s14 = sshll.u32 %s194_s13, 1  ;;  %v252_v11 = vshrl.u32 %v251_v10, 7  ;;  %s352_s23 = sshll.u32 %s476_s9, 3 }
   0xf   : > { %p196_p5 = scmp.lt.s32.totalorder %s348_s14, 1  ;;  %s219_s26 = scalar_lea.vmem %s468_s2, %s352_s23 }
  0x10   : > { %v253_v12 = vadd.s32 8, %v252_v11  ;;  %v255_v14 = vadd.s32 %v254_v13, %v252_v11 }
  0x11   : > { %s474_s14 = smov (!%p196_p5, %s348_s14), 1 }
  0x12   : > { %s349_s15 = sshll.u32 %s474_s14, 3  ;;  %v256_v15 = vadd.s32 %v254_v13, %v253_v12  ;;  %vm257_vm4 = vcmp.lt.s32.totalorder %v255_v14, 16 }
  0x13   : > { %s199_s18 = scalar_lea.vmem %s466_s0, %s349_s15  ;;  %s211_s21 = scalar_lea.vmem %s467_s1, %s349_s15 }
  0x14   : > { %v225_v0 = vld [vmem:[%s199_s18] sm:$0xff]  ;;  %v226_v1 = vld [vmem:[%s199_s18 + $0x8] sm:$0xff]  ;;  %vm258_vm5 = vcmp.lt.s32.totalorder %v256_v15, 16 }
  0x15   : > { %v227_v2 = vld [vmem:[%s211_s21] sm:$0xff]  ;;  %v228_v3 = vld [vmem:[%s211_s21 + $0x8] sm:$0xff] }
  0x16   : > { %v229_v4 = vsub.f32 %v225_v0, %v227_v2  ;;  %v230_v5 = vsub.f32 %v226_v1, %v228_v3 }
  0x18   : > { %v231_v6 = vmul.f32 %v229_v4, %v229_v4  ;;  %v232_v7 = vmul.f32 %v230_v5, %v230_v5 }
  0x1a   : > { %v233_v8 = vadd.f32 1e-06, %v231_v6  ;;  %v234_v9 = vadd.f32 1e-06, %v232_v7 }
  0x1c   : > { %380 = vrsqrt.f32 %v233_v8  ;;  %vm237_vm0 = vcmp.eq.f32.partialorder %v233_v8, inf  ;;  %v240_v17 = vand.u32 2147483648, %v233_v8  ;;  %vm239_vm1 = vcmp.eq.f32.partialorder %v233_v8, 0.0 }
  0x1d   : > { %382 = vrsqrt.f32 %v234_v9  ;;  %vm244_vm2 = vcmp.eq.f32.partialorder %v234_v9, inf  ;;  %v247_v20 = vand.u32 2147483648, %v234_v9  ;;  %vm246_vm3 = vcmp.eq.f32.partialorder %v234_v9, 0.0 }
  0x29   : > { %v381_v16 = vpop.eup %380 }
  0x2a   : > { %v383_v18 = vpop.eup %382  ;;  %v236_v19 = vmul.f32 %v381_v16, %v233_v8 }
  0x2b   : > { %v243_v21 = vmul.f32 %v383_v18, %v234_v9 }
  0x2c   : > { %v238_v22 = vsel %vm237_vm0, %v233_v8, %v236_v19 }
  0x2d   : > { %v241_v23 = vsel %vm239_vm1, %v240_v17, %v238_v22  ;;  %v245_v24 = vsel %vm244_vm2, %v234_v9, %v243_v21 }
  0x2e   : > { %v248_v25 = vsel %vm246_vm3, %v247_v20, %v245_v24  ;;  %v259_v26 = vsel %vm257_vm4, %v241_v23, 0.0 }
  0x2f   : > { %v260_v27 = vsel %vm258_vm5, %v248_v25, 0.0 }
  0x30   : > { %v262_v28 = vadd.f32 %v260_v27, %v259_v26 }
  0x32   : > { %269 = vst [vmem:[%s219_s26] sm:$0xff] %v262_v28 }
  0x33 PF: > { %s12_s11 = sadd.s32 1, %s406_s11   ;;  %s469_s9 = smov %s402_s10 }
  0x34   : > { %p9_p7 = scmp.ge.s32.totalorder %s12_s11, 4   ;;  %s470_s10 = smov %s472_s12 }
  0x36   :  { %11 = sbr.rel (!%p9_p7) target bundleno = 2 (0x2), region = 69 }

</bundles_post_ra>
